<compile_context>
chip_gen: v6e
topology: v6e:2x2x1
jax: 0.10.0
libtpu: 0.0.40
codegen_flags: <defaults>
</compile_context>

<pallas_src>
import functools

import jax
import jax.numpy as jnp
from jax import lax
from jax.experimental import pallas as pl
from jax.experimental.pallas import tpu as pltpu


def _pick_tile(total, max_tile):
    """Largest multiple of 128 that divides `total` and is <= max_tile.
    Falls back to `total` (full extent) when total is small or no divisor fits."""
    if total <= max_tile:
        return total
    best = 0
    t = 128
    while t <= max_tile:
        if total % t == 0:
            best = t
        t += 128
    return best if best else total


# ---------------------------------------------------------------------------
# Kernel 1: 1x1 conv offset head, epilogue constants pre-folded on host
#   off[Cout, n] = (0.25*W)[Cout, C] @ x[C, n] + (0.25*bias + init_pos)[Cout, 1]
# ---------------------------------------------------------------------------
def offset_kernel(x_ref, w_ref, b_ref, o_ref):
    o_ref[0] = (jnp.dot(w_ref[...], x_ref[0],
                        preferred_element_type=jnp.float32)
                + b_ref[...])


def offset_conv(x3, wp, bp):
    B, C, N = x3.shape
    Cout = wp.shape[0]
    tn = _pick_tile(N, 8192)
    return pl.pallas_call(
        offset_kernel,
        out_shape=jax.ShapeDtypeStruct((B, Cout, N), jnp.float32),
        grid_spec=pltpu.PrefetchScalarGridSpec(
            num_scalar_prefetch=0,
            grid=(B, N // tn),
            in_specs=[
                pl.BlockSpec((1, C, tn), lambda b, j: (b, 0, j)),
                pl.BlockSpec((Cout, C), lambda b, j: (0, 0)),
                pl.BlockSpec((Cout, 1), lambda b, j: (0, 0)),
            ],
            out_specs=pl.BlockSpec((1, Cout, tn), lambda b, j: (b, 0, j)),
        ),
        compiler_params=pltpu.CompilerParams(
            dimension_semantics=("parallel", "parallel")),
    )(x3, wp, bp)


# ---------------------------------------------------------------------------
# Kernel 2: factorized bilinear grid_sample (align_corners=False, border pad)
#   per (batch*group, S-tile):
#     stage A (MXU): t[(c,h), s] = sum_w x[(c,h), w] * colT[w, s]
#     stage B (VPU): o[c, s]     = sum_h t[c, h, s]  * rowT[h, s]
# ---------------------------------------------------------------------------
def sample_kernel(coords_ref, x_ref, o_ref, *, H, W, scale, Cg):
    tS = o_ref.shape[2]
    sW = W * scale
    s0 = pl.program_id(1) * tS

    c = coords_ref[0]                       # [2, tS]
    cx = c[0:1, :]                          # [1, tS]  x-offsets
    cy = c[1:2, :]                          # [1, tS]  y-offsets

    # base (source) pixel for each output pixel of this S-tile
    p = lax.broadcasted_iota(jnp.int32, (1, tS), 1) + s0
    base_w = (p % sW) // scale
    base_h = (p // sW) // scale

    # unnormalized grid_sample coords; padding_mode='border' -> clamp
    px = jnp.clip(base_w.astype(jnp.float32) + cx, 0.0, float(W - 1))
    py = jnp.clip(base_h.astype(jnp.float32) + cy, 0.0, float(H - 1))

    x0f = jnp.floor(px)
    y0f = jnp.floor(py)
    wx = px - x0f
    wy = py - y0f
    x0 = x0f.astype(jnp.int32)
    y0 = y0f.astype(jnp.int32)
    x1 = jnp.minimum(x0 + 1, W - 1)
    y1 = jnp.minimum(y0 + 1, H - 1)

    # column-interp matrix (transposed): [W, tS]
    wio = lax.broadcasted_iota(jnp.int32, (W, tS), 0)
    colT = ((wio == x0).astype(jnp.float32) * (1.0 - wx)
            + (wio == x1).astype(jnp.float32) * wx)

    # stage A: [Cg*H, W] @ [W, tS] -> [Cg*H, tS]   (MXU, output lane-dense)
    t = jnp.dot(x_ref[0], colT, preferred_element_type=jnp.float32)

    # row-interp matrix: [H, tS]
    hio = lax.broadcasted_iota(jnp.int32, (H, tS), 0)
    rowT = ((hio == y0).astype(jnp.float32) * (1.0 - wy)
            + (hio == y1).astype(jnp.float32) * wy)

    # stage B: weighted reduce over the H axis -> [Cg, tS]
    t3 = t.reshape(Cg, H, tS)
    o_ref[0] = jnp.sum(t3 * rowT[None, :, :], axis=1)


def bilinear_sample(coords, x_rows, *, H, W, scale, Cg):
    BG, _, S = coords.shape
    CgH = x_rows.shape[1]
    tS = _pick_tile(S, 4096)
    kern = functools.partial(sample_kernel, H=H, W=W, scale=scale, Cg=Cg)
    return pl.pallas_call(
        kern,
        out_shape=jax.ShapeDtypeStruct((BG, Cg, S), jnp.float32),
        grid_spec=pltpu.PrefetchScalarGridSpec(
            num_scalar_prefetch=0,
            grid=(BG, S // tS),
            in_specs=[
                pl.BlockSpec((1, 2, tS), lambda i, j: (i, 0, j)),
                pl.BlockSpec((1, CgH, W), lambda i, j: (i, 0, 0)),
            ],
            out_specs=pl.BlockSpec((1, Cg, tS), lambda i, j: (i, 0, j)),
        ),
        compiler_params=pltpu.CompilerParams(
            dimension_semantics=("parallel", "parallel")),
    )(coords, x_rows)


# ---------------------------------------------------------------------------
# Parameter / buffer setup and full forward (glue in plain JAX)
# ---------------------------------------------------------------------------
def make_init_pos(scale, groups):
    # torch: h = arange((-s+1)/2, (s-1)/2 + 1) / s
    h = (jnp.arange(scale, dtype=jnp.float32) - (scale - 1) / 2.0) / scale
    t0 = jnp.broadcast_to(h[None, :], (scale, scale))   # x-offset varies with col
    t1 = jnp.broadcast_to(h[:, None], (scale, scale))   # y-offset varies with row
    t = jnp.stack([t0, t1])                              # [2, s, s]
    return jnp.tile(t, (1, groups, 1)).reshape(-1)       # [2*G*s*s]


def dysample_up(x, weight, bias, *, scale=2, groups=4):
    B, C, H, W = x.shape
    G, s = groups, scale
    assert C % G == 0
    Cg = C // G
    sH, sW = s * H, s * W
    Cout = 2 * G * s * s
    N = H * W
    S = sH * sW

    # fold "* 0.25 + init_pos" into the conv parameters (exact: 0.25 = 2^-2)
    init_pos = make_init_pos(s, G)
    wp = (weight * 0.25).astype(jnp.float32)                     # [Cout, C]
    bp = (bias * 0.25 + init_pos).reshape(Cout, 1).astype(jnp.float32)

    # --- offset head (Pallas kernel 1), lane-dense over spatial ---
    offs = offset_conv(x.reshape(B, C, N), wp, bp)               # [B, Cout, N]

    # --- pixel-shuffle of offsets into per-(batch,group) coords [B*G, 2, S] ---
    # Only remaining XLA transpose; it touches just the small offset tensor.
    coords = (offs.reshape(B, 2, G, s, s, H, W)
              .transpose(0, 2, 1, 5, 3, 6, 4)                    # [B, G, 2, H, s, W, s]
              .reshape(B * G, 2, S))

    # --- per-group features: pure reshape of NCHW (no HBM copy) ---
    x_rows = x.reshape(B * G, Cg * H, W)                          # [(b,g), Cg*H, W]

    # --- factorized bilinear grid sample (Pallas kernel 2) ---
    samp = bilinear_sample(coords, x_rows, H=H, W=W, scale=s, Cg=Cg)  # [BG, Cg, S]

    # [B*G, Cg, sH*sW] -> [B, C, sH, sW] is a pure reshape (no copy)
    return samp.reshape(B, C, sH, sW)


# ---------------------------------------------------------------------------
# Pure-JAX reference (same math, gather-based) for correctness checking
# ---------------------------------------------------------------------------
def reference(x, weight, bias, *, scale=2, groups=4):
    B, C, H, W = x.shape
    G, s = groups, scale
    Cg = C // G
    sH, sW = s * H, s * W
    init_pos = make_init_pos(s, G)

    xf = x.transpose(0, 2, 3, 1).reshape(-1, C)
    off = (xf @ weight.T + bias) * 0.25
    off = off.reshape(B, H, W, -1) + init_pos.reshape(1, 1, 1, -1)
    off = (off.reshape(B, H, W, 2, G, s, s)
           .transpose(0, 4, 1, 5, 2, 6, 3)
           .reshape(B * G, sH, sW, 2))

    bw = (jnp.arange(sW) // s).astype(jnp.float32)[None, None, :]
    bh = (jnp.arange(sH) // s).astype(jnp.float32)[None, :, None]
    px = jnp.clip(bw + off[..., 0], 0.0, W - 1.0)
    py = jnp.clip(bh + off[..., 1], 0.0, H - 1.0)
    x0f = jnp.floor(px); y0f = jnp.floor(py)
    wx = px - x0f; wy = py - y0f
    x0 = x0f.astype(jnp.int32); y0 = y0f.astype(jnp.int32)
    x1 = jnp.minimum(x0 + 1, W - 1); y1 = jnp.minimum(y0 + 1, H - 1)

    xg = (x.reshape(B, G, Cg, H, W)
          .reshape(B * G, Cg, H, W)
          .transpose(0, 2, 3, 1))                        # [BG, H, W, Cg]
    bidx = jnp.arange(B * G)[:, None, None]

    def gat(yi, xi):
        return xg[bidx, yi, xi]                          # [BG, sH, sW, Cg]

    out = (gat(y0, x0) * ((1 - wx) * (1 - wy))[..., None]
           + gat(y0, x1) * (wx * (1 - wy))[..., None]
           + gat(y1, x0) * ((1 - wx) * wy)[..., None]
           + gat(y1, x1) * (wx * wy)[..., None])
    return (out.reshape(B, G, sH, sW, Cg)
            .transpose(0, 1, 4, 2, 3)
            .reshape(B, C, sH, sW))


if __name__ == "__main__":
    B, C, H, W = 2, 8, 16, 16
    scale, groups = 2, 4
    Cout = 2 * groups * scale ** 2

    key = jax.random.PRNGKey(0)
    kx, kw = jax.random.split(key)
    x = jax.random.normal(kx, (B, C, H, W), dtype=jnp.float32)
    # nn.Conv2d(C, Cout, 1): weight [Cout, C], normal_init std=0.001, bias=0
    weight = jax.random.normal(kw, (Cout, C), dtype=jnp.float32) * 0.001
    bias = jnp.zeros((Cout,), dtype=jnp.float32)
    # TODO(synk): dyscope=True ('scope' conv + sigmoid gate) and style='pl'
    # branches are not instantiated in the default config and are not implemented.

    out = dysample_up(x, weight, bias, scale=scale, groups=groups)
    out = jax.block_until_ready(out)

    assert out.shape == (B, C, scale * H, scale * W), out.shape
    ref = reference(x, weight, bias, scale=scale, groups=groups)
    assert jnp.allclose(out, ref, atol=1e-4, rtol=1e-4), (
        float(jnp.max(jnp.abs(out - ref))))

    print("KERNEL_OK")
</pallas_src>

<mosaic_0001>
module attributes {stable_mosaic.version = 11 : i64} {
  func.func @offset_kernel(%arg0: i32, %arg1: i32, %arg2: memref<1x8x256xf32, #tpu.memory_space<vmem>>, %arg3: memref<32x8xf32, #tpu.memory_space<vmem>>, %arg4: memref<32x1xf32, #tpu.memory_space<vmem>>, %arg5: memref<1x32x256xf32, #tpu.memory_space<vmem>>) attributes {dimension_semantics = [#tpu.dimension_semantics<parallel>, #tpu.dimension_semantics<parallel>], iteration_bounds = array<i64: 2, 1>, scalar_prefetch = 0 : i64, scratch_operands = 0 : i64, tpu.core_type = #tpu.core_type<tc>, window_params = [{transform_indices = @transform_0, window_bounds = array<i64: 1, 8, 256>}, {pipeline_mode = #tpu.pipeline_mode<synchronous>, transform_indices = @transform_1, window_bounds = array<i64: 32, 8>}, {pipeline_mode = #tpu.pipeline_mode<synchronous>, transform_indices = @transform_2, window_bounds = array<i64: 32, 1>}, {transform_indices = @transform_3, window_bounds = array<i64: 1, 32, 256>}]} {
    %c0 = arith.constant 0 : index
    %c0_0 = arith.constant 0 : index
    %0 = vector.load %arg3[%c0, %c0_0] : memref<32x8xf32, #tpu.memory_space<vmem>>, vector<32x8xf32>
    %c0_1 = arith.constant 0 : index
    %c0_2 = arith.constant 0 : index
    %c0_3 = arith.constant 0 : index
    %1 = vector.load %arg2[%c0_1, %c0_2, %c0_3] : memref<1x8x256xf32, #tpu.memory_space<vmem>>, vector<1x8x256xf32>
    %2 = vector.shape_cast %1 : vector<1x8x256xf32> to vector<8x256xf32>
    %cst = arith.constant dense<0.000000e+00> : vector<32x256xf32>
    %3 = tpu.matmul %0, %2, %cst {dimension_numbers = #tpu.dot_dimension_numbers<[1], [0], [0], [1], [0, 0, 1, 1], [], []>} : vector<32x8xf32>, vector<8x256xf32>, vector<32x256xf32> -> vector<32x256xf32>
    %c0_4 = arith.constant 0 : index
    %c0_5 = arith.constant 0 : index
    %4 = vector.load %arg4[%c0_4, %c0_5] : memref<32x1xf32, #tpu.memory_space<vmem>>, vector<32x1xf32>
    %5 = vector.broadcast %4 : vector<32x1xf32> to vector<32x256xf32>
    %6 = arith.addf %3, %5 : vector<32x256xf32>
    %c0_6 = arith.constant 0 : index
    %c0_7 = arith.constant 0 : index
    %c0_8 = arith.constant 0 : index
    %7 = vector.load %arg5[%c0_6, %c0_7, %c0_8] : memref<1x32x256xf32, #tpu.memory_space<vmem>>, vector<1x32x256xf32>
    %8 = vector.shape_cast %7 : vector<1x32x256xf32> to vector<32x256xf32>
    %9 = vector.shape_cast %6 : vector<32x256xf32> to vector<1x32x256xf32>
    tpu.vector_store %arg5[%c0_6, %c0_7, %c0_8], %9 {strides = array<i32>} : memref<1x32x256xf32, #tpu.memory_space<vmem>>, vector<1x32x256xf32>,
    return
  }
  func.func @transform_0(%arg0: i32, %arg1: i32) -> (i32, i32, i32) {
    %c0_i32 = arith.constant 0 : i32
    %c0_i32_0 = arith.constant 0 : i32
    return %arg0, %c0_i32, %arg1 : i32, i32, i32
  }
  func.func @transform_1(%arg0: i32, %arg1: i32) -> (i32, i32) {
    %c0_i32 = arith.constant 0 : i32
    %c0_i32_0 = arith.constant 0 : i32
    %c0_i32_1 = arith.constant 0 : i32
    return %c0_i32, %c0_i32_0 : i32, i32
  }
  func.func @transform_2(%arg0: i32, %arg1: i32) -> (i32, i32) {
    %c0_i32 = arith.constant 0 : i32
    %c0_i32_0 = arith.constant 0 : i32
    %c0_i32_1 = arith.constant 0 : i32
    return %c0_i32, %c0_i32_0 : i32, i32
  }
  func.func @transform_3(%arg0: i32, %arg1: i32) -> (i32, i32, i32) {
    %c0_i32 = arith.constant 0 : i32
    %c0_i32_0 = arith.constant 0 : i32
    return %arg0, %c0_i32, %arg1 : i32, i32, i32
  }
}

</mosaic_0001>

<bundles_post_ra>
// kernel: tpu_custom_call.1
= control target key start
LH: loop header
LB: loop body
LE: loop exit
PB: predicated region body
PF: predicated region fallthrough
CT: control target
= control target key end

     0   :  { %8 = vsyncpa [#allocation3], 0  ;;  %s766_s0 = inlined_call_operand.vmem [shape: f32[2,8,256], index: 0, kind: input, shape index: {}]   ;;  %s767_s1 = inlined_call_operand.vmem [shape: f32[32,8], index: 1, kind: input, shape index: {}]   ;;  %s768_s2 = inlined_call_operand.vmem [shape: f32[32,1], index: 2, kind: input, shape index: {}]   ;;  %s769_s3 = inlined_call_operand.hbm [shape: f32[2,32,256], index: 3, kind: output, shape index: {}]  }
   0x1   :  { %10 = vsyncpa [#allocation3 + $0x1], 0  ;;  %s620_s12 = smov 0   ;;  %s622_s13 = smov 0  }
   0x2   :  { %s624_s14 = smov 0   ;;  %s626_s15 = smov 0  }
   0x3   :  { %s628_s16 = smov 0   ;;  %s630_s17 = smov 0  }
   0x4 LB: > { %s435_s18 = sadd.s32 4294967295, %s593_s17   ;;  %s436_s19 = sadd.s32 4294967294, %s593_s17   ;;  %s593_s17 = sphi %s630_s17, %s16_s17   ;;  %s589_s16 = sphi %s628_s16, %s776_s16   ;;  %s585_s15 = sphi %s626_s15, %s775_s15   ;;  %s581_s14 = sphi %s624_s14, %s774_s14   ;;  %s577_s13 = sphi %s622_s13, %s773_s13   ;;  %s573_s12 = sphi %s620_s12, %s772_s12  }
   0x5   : > { %s28_s20 = sadd.s32 1, %s589_s16  ;;  %s107_s21 = sadd.s32 1, %s581_s14 }
   0x6   : > { %p30_p0 = scmp.ge.s32.totalorder %s28_s20, 2  ;;  %p117_p1 = scmp.ne.s32.totalorder %s581_s14, %s577_s13 }
   0x7   : > { %p118_p2 = scmp.eq.s32.totalorder %s435_s18, 1  ;;  %p123_p3 = scmp.ne.s32.totalorder %s577_s13, %s573_s12 }
   0x8   : > { %s778_s20 = smov (%p30_p0, %s28_s20), 0  ;;  %p124_p5 = scmp.eq.s32.totalorder %s436_s19, 1 }
   0x9   : > { %p660_p4 = por %p118_p2, %p117_p1  ;;  %s102_s23 = ssub.s32 %s589_s16, %s778_s20 }
   0xa   : > { %p439_p6 = scmp.ge.s32.totalorder %s593_s17, 1  ;;  %p105_p7 = scmp.eq.s32.totalorder %s102_s23, 0 }
   0xb   : > { %p667_p8 = por %p124_p5, %p123_p3  ;;  %p161_p9 = scmp.lt.s32.totalorder %s593_s17, 3 }
   0xc   : > { %s673_s25 = scalar_select %p105_p7, %s581_s14, %s107_s21  }
   0xd   : > { %p162_p10 = pnand %p439_p6, %p161_p9 }
   0xe   : > { %p190_p11 = scmp.lt.s32.totalorder (!%p162_p10), %s585_s15, 1  ;;  %s453_s6 = sshll.u32 (!%p162_p10), %s585_s15, 10 }
   0xf   : > { %165 = sbr.rel (%p162_p10) target bundleno = 242 (0xf2), region = 32  ;;  %s715_s10 = scalar_lea.hbm (!%p162_p10), %s769_s3, %s453_s6 }
  0x10   : > { %s597_s18 = smov (!%p162_p10), [#allocation2]  }
  0x11   : > { %s521_s19 = sshll.u32 (!%p162_p10), %s597_s18, 4  ;;  %s522_s19 = int_to_ptr.vmem [resolvable:$false] %s521_s19 }
  0x12   : > { %s523_s21 = scalar_lea.vmem (!%p162_p10), %s522_s19, 2048 }
  0x14   : > { %v595_v0 = vmov 0.0   ;;  %v208_v1 = vld [vmem:[%s768_s2 + $0x10] sm:$0xff]  ;;  %v206_v2 = vld [vmem:[%s768_s2] sm:$0xff]  ;;  %s191_s30 = scalar_select %p190_p11, %s585_s15, 1  ;;  %v596_v3 = vmov 0   ;;  %vm230_vm0 = vcmask 64512  }
  0x15   : > { %307 = vmatprep.mubr.f32.mxu0 %v595_v0  ;;  %319 = vmatprep.mubr.f32.mxu1 %v595_v0  ;;  %v200_v4 = vld [vmem:[%s767_s1] sm:$0xff]  ;;  %v202_v7 = vld [vmem:[%s767_s1 + $0x10] sm:$0xff]  ;;  %v209_v8 = vld [vmem:[%s768_s2 + $0x18] sm:$0xff] }
  0x16   : > { %516 = vset.pattern.permute.xlu1 %v596_v3  ;;  %515 = vset.pattern.permute.xlu0 %v596_v3  ;;  %s452_s4 = sshll.u32 %s191_s30, 4  ;;  %v207_v9 = vld [vmem:[%s768_s2 + $0x8] sm:$0xff]  ;;  %v203_v11 = vld [vmem:[%s767_s1 + $0x18] sm:$0xff]  ;;  %s186_s30 = sand.u32 1, %s577_s13  }
  0x17   : > { %222 = vperm.xlu1 %516, %v208_v1   ;;  %212 = vperm.xlu0 %515, %v206_v2   ;;  %s197_s7 = scalar_lea.vmem %s766_s0, %s452_s4  ;;  %v201_v10 = vld [vmem:[%s767_s1 + $0x8] sm:$0xff]  ;;  %s440_s4 = sshll.u32 %s186_s30, 6 }
  0x18   : > { %v205_v5 = vld [vmem:[%s197_s7 + $0x8] sm:$0xff]  ;;  %v204_v6 = vld [vmem:[%s197_s7] sm:$0xff]  ;;  %s188_s5 = scalar_lea.vmem [#allocation2], %s440_s4  ;;  %s721_s15 = scalar_lea.sflag [#allocation3], %s186_s30 }
  0x19   : > { %273 = vmatprep.subr.mxu0 %v205_v5  ;;  %454 = vmatprep.subr.mxu1 %v205_v5  ;;  %s356_s7 = sshll.u32 %s188_s5, 4  ;;  %s717_s7 = int_to_ptr.vmem [resolvable:$true] %s356_s7 }
  0x1a   : > { %274 = vmatpush1.msra.mxu0 %v204_v6  ;;  %455 = vmatpush1.msra.mxu1 %v204_v6  ;;  %s517_s11 = scalar_lea.vmem %s717_s7, 1024  ;;  %p524_p1 = scmp.lt.s32.totalorder %s717_s7, %s522_s19 }
  0x1b   : > { %443 = vmatmul.mubr.msk.f32.vlgmr.msra.gmra.mxu0 %vm230_vm0, %v200_v4  ;;  %445 = vmatmul.mubr.msk.f32.vlgmr.msra.gmra.mxu1 %vm230_vm0, %v202_v7  ;;  %p518_p12 = scmp.ne.s32.totalorder %s717_s7, %s517_s11  ;;  %p525_p2 = scmp.lt.s32.totalorder %s523_s21, %s517_s11 }
  0x1c   : > { %313 = vmatprep.mubr.f32.mxu0 %v595_v0  ;;  %325 = vmatprep.mubr.f32.mxu1 %v595_v0 }
  0x1d   : > { %227 = vperm.xlu1 %516, %v209_v8   ;;  %217 = vperm.xlu0 %515, %v207_v9   ;;  %p519_p13 = pnand %p518_p12, %p660_p4  ;;  %p526_p3 = por %p525_p2, %p524_p1 }
  0x1f   : > { %444 = vmatmul.mubr.msk.f32.gmra.mxu0 %vm230_vm0, %v201_v10  ;;  %446 = vmatmul.mubr.msk.f32.gmra.mxu1 %vm230_vm0, %v203_v11  ;;  %p520_p0 = pneg %p519_p13 }
  0x21   : > { %p527_p5 = pnand %p526_p3, %p520_p0 }
  0x92   : > { %v223_v12 = vpop.permute.xlu1 %222  ;;  %v213_v13 = vpop.permute.xlu0 %212 }
  0x98   : > { %v228_v20 = vpop.permute.xlu1 %227  ;;  %v218_v21 = vpop.permute.xlu0 %217 }
  0xdb   : > { %v309_v14 = vpop.f32.mrf.mxu0  ;;  %v321_v15 = vpop.f32.mrf.mxu1 }
  0xdc   : > { %v310_v16 = vadd.f32 %v309_v14, %v213_v13  ;;  %v322_v17 = vadd.f32 %v321_v15, %v223_v12 }
  0xdd   : > { %v311_v18 = vpop.f32.mrf.mxu0  ;;  %v323_v19 = vpop.f32.mrf.mxu1 }
  0xde   : > { %332 = vst [vmem:[%s188_s5] sm:$0xff] %v310_v16  ;;  %336 = vst [vmem:[%s188_s5 + $0x20] sm:$0xff] %v322_v17  ;;  %v312_v22 = vadd.f32 %v311_v18, %v213_v13  ;;  %v324_v23 = vadd.f32 %v323_v19, %v223_v12 }
  0xdf   : > { %v315_v24 = vpop.f32.mrf.mxu0  ;;  %v327_v25 = vpop.f32.mrf.mxu1 }
  0xe0   : > { %333 = vst [vmem:[%s188_s5 + $0x8] sm:$0xff] %v312_v22  ;;  %337 = vst [vmem:[%s188_s5 + $0x28] sm:$0xff] %v324_v23  ;;  %v316_v26 = vadd.f32 %v315_v24, %v218_v21  ;;  %v328_v27 = vadd.f32 %v327_v25, %v228_v20 }
  0xe1   : > { %v317_v28 = vpop.f32.mrf.mxu0  ;;  %v329_v29 = vpop.f32.mrf.mxu1 }
  0xe2   : > { %334 = vst [vmem:[%s188_s5 + $0x10] sm:$0xff] %v316_v26  ;;  %338 = vst [vmem:[%s188_s5 + $0x30] sm:$0xff] %v328_v27  ;;  %v318_v30 = vadd.f32 %v317_v28, %v218_v21  ;;  %v330_v31 = vadd.f32 %v329_v29, %v228_v20 }
  0xe4   : > { %335 = vst [vmem:[%s188_s5 + $0x18] sm:$0xff] %v318_v30  ;;  %339 = vst [vmem:[%s188_s5 + $0x38] sm:$0xff] %v330_v31 }
  0xe5   : > { %530 = shalt.err (!%p527_p5)
}
  0xe6   : > { %s531_s23 = scalar_lea.hbm %s715_s10, 1024  ;;  %s535_s28 = scalar_lea.hbm %s769_s3, 2048 }
  0xe7   : > { %p532_p6 = scmp.ne.s32.totalorder %s715_s10, %s531_s23  ;;  %p536_p10 = scmp.lt.s32.totalorder %s715_s10, %s769_s3 }
  0xe8   : > { %p537_p11 = scmp.lt.s32.totalorder %s535_s28, %s531_s23 }
  0xe9   : > { %p533_p7 = pnand %p532_p6, %p660_p4 }
  0xea   : > { %p538_p12 = por %p537_p11, %p536_p10 }
  0xeb   : > { %p534_p9 = pneg %p533_p7 }
  0xed   : > { %p539_p13 = pnand %p538_p12, %p534_p9 }
  0xef   : > { %542 = shalt.err (!%p539_p13)
}
  0xf0   : > { %s598_s4 = smov 256   ;;  %s599_s5 = smov 16  }
  0xf1   : > { %456 = dma.vmem_to_hbm [thread:$0]  (%p660_p4), %s717_s7, 1024, %s715_s10, %s721_s15, %s598_s4, %s598_s4, %s599_s5  }
  0xf2 PF: > { %p462_p0 = scmp.ge.s32.totalorder %s593_s17, 2  ;;  %s371_s6 = sand.u32 1, %s573_s12  }
  0xf3   : > { %s372_s8 = scalar_lea.sflag [#allocation3], %s371_s6 }
  0xf4   : > { %p459_p1 = pnand %p462_p0, %p667_p8 }
  0xf6   : > { %p460_p2 = pneg %p459_p1 }
  0xf8   : > { %568 = dma.done.wait (%p460_p2), %s372_s8, 1024  }
  0xf9   : > { %570 = vsyncadd (%p460_p2), %s372_s8, 4294966272  ;;  %s16_s17 = sadd.s32 1, %s593_s17   ;;  %s772_s12 = smov %s577_s13 }
  0xfa   : > { %p13_p3 = scmp.ge.s32.totalorder %s16_s17, 4   ;;  %s773_s13 = smov %s581_s14 }
  0xfb   : > { %s774_s14 = smov %s673_s25  ;;  %s775_s15 = smov %s589_s16 }
  0xfc   : > { %s776_s16 = smov %s778_s20  ;;  %15 = sbr.rel (!%p13_p3) target bundleno = 4 (0x4), region = 67 }
 0x101   :  { %377 = vsyncpa [#allocation3], 1 }
 0x102   :  { %379 = vsyncpa [#allocation3 + $0x1], 1 }

</bundles_post_ra>
